<compile_context>
chip_gen: v5e
topology: v5e:2x2
jax: 0.10.0
libtpu: 0.0.40
codegen_flags: <defaults>
</compile_context>

<pallas_src>
import jax
import jax.numpy as jnp
from jax.experimental import pallas as pl
from jax.experimental.pallas import tpu as pltpu


def _mix_kernel(x1_ref, x2_ref, w1_ref, w2_ref, b_ref, o_ref):
    # x1_ref: (C1, T)   x2_ref: (C2, T)
    # w1_ref: (Cout, C1) w2_ref: (Cout, C2)  b_ref: (Cout, 1)
    # o_ref:  (Cout, T)  — lane-dense output (T is a multiple of 128 or == H*W)
    acc = jnp.dot(w1_ref[...], x1_ref[...], preferred_element_type=jnp.float32)
    acc = acc + jnp.dot(w2_ref[...], x2_ref[...],
                        preferred_element_type=jnp.float32)
    o_ref[...] = (acc + b_ref[...]).astype(o_ref.dtype)


def _pick_hw_tile(hw: int, max_tile: int = 2048) -> int:
    """Largest multiple of 128 that divides hw and is <= max_tile.
    If hw is not a multiple of 128, use the full extent (legal block dim)."""
    if hw % 128 != 0:
        return hw
    t = (min(max_tile, hw) // 128) * 128
    while hw % t != 0:
        t -= 128
    return t


def weighted_sum_tensor_pallas(x1, x2, w, b, *, max_hw_tile=2048):
    """x1: (N, C1, H, W), x2: (N, C2, H, W) in NCHW (PyTorch convention).
    w: (Cout, C1+C2) 1x1-conv weight (kernel dims squeezed), b: (Cout,).
    Returns (N, Cout, H, W).

    Optionally pass bf16 x1/x2/w/b for ~2x HBM-bandwidth savings on v6e/v7x;
    accumulation stays in f32 inside the kernel."""
    N, C1, H, W = x1.shape
    _, C2, _, _ = x2.shape
    Cout = w.shape[0]
    HW = H * W

    # Zero-copy reshapes: keep NCHW, put spatial on the lane axis.
    x1_r = x1.reshape(N, C1, HW)
    x2_r = x2.reshape(N, C2, HW)

    # Split weight for the two inputs; kernel does W1@x1 + W2@x2 + b.
    w1 = w[:, :C1]              # (Cout, C1)
    w2 = w[:, C1:]              # (Cout, C2)
    b2d = b.reshape(Cout, 1)    # broadcasts along lanes in-kernel

    T = _pick_hw_tile(HW, max_hw_tile)
    grid = (N, HW // T)

    out = pl.pallas_call(
        _mix_kernel,
        out_shape=jax.ShapeDtypeStruct((N, Cout, HW), x1.dtype),
        grid_spec=pltpu.PrefetchScalarGridSpec(
            num_scalar_prefetch=0,
            grid=grid,
            in_specs=[
                pl.BlockSpec((pl.Squeezed(), C1, T), lambda n, j: (n, 0, j)),
                pl.BlockSpec((pl.Squeezed(), C2, T), lambda n, j: (n, 0, j)),
                pl.BlockSpec((Cout, C1), lambda n, j: (0, 0)),
                pl.BlockSpec((Cout, C2), lambda n, j: (0, 0)),
                pl.BlockSpec((Cout, 1), lambda n, j: (0, 0)),
            ],
            out_specs=pl.BlockSpec((pl.Squeezed(), Cout, T),
                                   lambda n, j: (n, 0, j)),
        ),
        compiler_params=pltpu.CompilerParams(
            dimension_semantics=("parallel", "parallel")),
    )(x1_r, x2_r, w1, w2, b2d)

    return out.reshape(N, Cout, H, W)


def _reference(x1, x2, w, b):
    x = jnp.concatenate([x1, x2], axis=1)              # (N, C1+C2, H, W)
    out = jnp.einsum("nchw,oc->nohw", x, w) + b[None, :, None, None]
    return out


if __name__ == "__main__":
    # Small shapes consistent with the module.
    N, H, W = 2, 16, 16
    C1, C2, Cout = 4, 6, 8

    key = jax.random.PRNGKey(0)
    k1, k2, kw, kb = jax.random.split(key, 4)

    x1 = jax.random.normal(k1, (N, C1, H, W), dtype=jnp.float32)
    x2 = jax.random.normal(k2, (N, C2, H, W), dtype=jnp.float32)

    # Deterministic init mimicking PyTorch Conv2d default (uniform +/- 1/sqrt(fan_in)).
    fan_in = C1 + C2  # kernel is 1x1
    bound = 1.0 / jnp.sqrt(fan_in)
    w = jax.random.uniform(kw, (Cout, C1 + C2), minval=-bound, maxval=bound,
                           dtype=jnp.float32)
    b = jax.random.uniform(kb, (Cout,), minval=-bound, maxval=bound,
                           dtype=jnp.float32)

    out = weighted_sum_tensor_pallas(x1, x2, w, b)
    out = jax.block_until_ready(out)

    ref = _reference(x1, x2, w, b)
    assert out.shape == (N, Cout, H, W)
    assert jnp.allclose(out, ref, atol=1e-5, rtol=1e-5)
    print("KERNEL_OK")
</pallas_src>

<mosaic_0001>
module attributes {stable_mosaic.version = 11 : i64} {
  func.func @_mix_kernel(%arg0: i32, %arg1: i32, %arg2: memref<1x4x256xf32, #tpu.memory_space<vmem>>, %arg3: memref<1x6x256xf32, #tpu.memory_space<vmem>>, %arg4: memref<8x4xf32, #tpu.memory_space<vmem>>, %arg5: memref<8x6xf32, #tpu.memory_space<vmem>>, %arg6: memref<8x1xf32, #tpu.memory_space<vmem>>, %arg7: memref<1x8x256xf32, #tpu.memory_space<vmem>>) attributes {dimension_semantics = [#tpu.dimension_semantics<parallel>, #tpu.dimension_semantics<parallel>], iteration_bounds = array<i64: 2, 1>, scalar_prefetch = 0 : i64, scratch_operands = 0 : i64, tpu.core_type = #tpu.core_type<tc>, window_params = [{transform_indices = @transform_0, window_bounds = array<i64: 1, 4, 256>}, {transform_indices = @transform_1, window_bounds = array<i64: 1, 6, 256>}, {pipeline_mode = #tpu.pipeline_mode<synchronous>, transform_indices = @transform_2, window_bounds = array<i64: 8, 4>}, {pipeline_mode = #tpu.pipeline_mode<synchronous>, transform_indices = @transform_3, window_bounds = array<i64: 8, 6>}, {pipeline_mode = #tpu.pipeline_mode<synchronous>, transform_indices = @transform_4, window_bounds = array<i64: 8, 1>}, {transform_indices = @transform_5, window_bounds = array<i64: 1, 8, 256>}]} {
    %c0 = arith.constant 0 : index
    %c0_0 = arith.constant 0 : index
    %0 = vector.load %arg4[%c0, %c0_0] : memref<8x4xf32, #tpu.memory_space<vmem>>, vector<8x4xf32>
    %c0_1 = arith.constant 0 : index
    %c0_2 = arith.constant 0 : index
    %c0_3 = arith.constant 0 : index
    %1 = vector.load %arg2[%c0_1, %c0_2, %c0_3] : memref<1x4x256xf32, #tpu.memory_space<vmem>>, vector<1x4x256xf32>
    %2 = vector.shape_cast %1 : vector<1x4x256xf32> to vector<4x256xf32>
    %cst = arith.constant dense<0.000000e+00> : vector<8x256xf32>
    %3 = tpu.matmul %0, %2, %cst {dimension_numbers = #tpu.dot_dimension_numbers<[1], [0], [0], [1], [0, 0, 1, 1], [], []>} : vector<8x4xf32>, vector<4x256xf32>, vector<8x256xf32> -> vector<8x256xf32>
    %c0_4 = arith.constant 0 : index
    %c0_5 = arith.constant 0 : index
    %4 = vector.load %arg5[%c0_4, %c0_5] : memref<8x6xf32, #tpu.memory_space<vmem>>, vector<8x6xf32>
    %c0_6 = arith.constant 0 : index
    %c0_7 = arith.constant 0 : index
    %c0_8 = arith.constant 0 : index
    %5 = vector.load %arg3[%c0_6, %c0_7, %c0_8] : memref<1x6x256xf32, #tpu.memory_space<vmem>>, vector<1x6x256xf32>
    %6 = vector.shape_cast %5 : vector<1x6x256xf32> to vector<6x256xf32>
    %cst_9 = arith.constant dense<0.000000e+00> : vector<8x256xf32>
    %7 = tpu.matmul %4, %6, %cst_9 {dimension_numbers = #tpu.dot_dimension_numbers<[1], [0], [0], [1], [0, 0, 1, 1], [], []>} : vector<8x6xf32>, vector<6x256xf32>, vector<8x256xf32> -> vector<8x256xf32>
    %8 = arith.addf %3, %7 : vector<8x256xf32>
    %c0_10 = arith.constant 0 : index
    %c0_11 = arith.constant 0 : index
    %9 = vector.load %arg6[%c0_10, %c0_11] : memref<8x1xf32, #tpu.memory_space<vmem>>, vector<8x1xf32>
    %10 = vector.broadcast %9 : vector<8x1xf32> to vector<8x256xf32>
    %11 = arith.addf %8, %10 : vector<8x256xf32>
    %c0_12 = arith.constant 0 : index
    %c0_13 = arith.constant 0 : index
    %c0_14 = arith.constant 0 : index
    %12 = vector.load %arg7[%c0_12, %c0_13, %c0_14] : memref<1x8x256xf32, #tpu.memory_space<vmem>>, vector<1x8x256xf32>
    %13 = vector.shape_cast %12 : vector<1x8x256xf32> to vector<8x256xf32>
    %14 = vector.shape_cast %11 : vector<8x256xf32> to vector<1x8x256xf32>
    tpu.vector_store %arg7[%c0_12, %c0_13, %c0_14], %14 {strides = array<i32>} : memref<1x8x256xf32, #tpu.memory_space<vmem>>, vector<1x8x256xf32>,
    return
  }
  func.func @transform_0(%arg0: i32, %arg1: i32) -> (i32, i32, i32) {
    %c0_i32 = arith.constant 0 : i32
    %c0_i32_0 = arith.constant 0 : i32
    return %arg0, %c0_i32, %arg1 : i32, i32, i32
  }
  func.func @transform_1(%arg0: i32, %arg1: i32) -> (i32, i32, i32) {
    %c0_i32 = arith.constant 0 : i32
    %c0_i32_0 = arith.constant 0 : i32
    return %arg0, %c0_i32, %arg1 : i32, i32, i32
  }
  func.func @transform_2(%arg0: i32, %arg1: i32) -> (i32, i32) {
    %c0_i32 = arith.constant 0 : i32
    %c0_i32_0 = arith.constant 0 : i32
    %c0_i32_1 = arith.constant 0 : i32
    return %c0_i32, %c0_i32_0 : i32, i32
  }
  func.func @transform_3(%arg0: i32, %arg1: i32) -> (i32, i32) {
    %c0_i32 = arith.constant 0 : i32
    %c0_i32_0 = arith.constant 0 : i32
    %c0_i32_1 = arith.constant 0 : i32
    return %c0_i32, %c0_i32_0 : i32, i32
  }
  func.func @transform_4(%arg0: i32, %arg1: i32) -> (i32, i32) {
    %c0_i32 = arith.constant 0 : i32
    %c0_i32_0 = arith.constant 0 : i32
    %c0_i32_1 = arith.constant 0 : i32
    return %c0_i32, %c0_i32_0 : i32, i32
  }
  func.func @transform_5(%arg0: i32, %arg1: i32) -> (i32, i32, i32) {
    %c0_i32 = arith.constant 0 : i32
    %c0_i32_0 = arith.constant 0 : i32
    return %arg0, %c0_i32, %arg1 : i32, i32, i32
  }
}

</mosaic_0001>

<bundles_post_ra>
// kernel: tpu_custom_call.1
= control target key start
LH: loop header
LB: loop body
LE: loop exit
PB: predicated region body
PF: predicated region fallthrough
CT: control target
= control target key end

     0   :  { %10 = vsyncpa [#allocation3], 0  ;;  %s825_s0 = inlined_call_operand.vmem [shape: f32[2,4,256], index: 0, kind: input, shape index: {}]   ;;  %s826_s1 = inlined_call_operand.vmem [shape: f32[2,6,256], index: 1, kind: input, shape index: {}]   ;;  %s827_s2 = inlined_call_operand.vmem [shape: f32[8,4], index: 2, kind: input, shape index: {}]   ;;  %s828_s3 = inlined_call_operand.vmem [shape: f32[8,6], index: 3, kind: input, shape index: {}]   ;;  %s829_s4 = inlined_call_operand.vmem [shape: f32[8,1], index: 4, kind: input, shape index: {}]   ;;  %s830_s5 = inlined_call_operand.hbm [shape: f32[2,8,256], index: 5, kind: output, shape index: {}]  }
   0x1   :  { %12 = vsyncpa [#allocation3 + $0x1], 0  ;;  %s716_s18 = smov 0   ;;  %s718_s19 = smov 0  }
   0x2   :  { %s720_s20 = smov 0   ;;  %s722_s21 = smov 0  }
   0x3   :  { %s724_s22 = smov 0   ;;  %s726_s23 = smov 0  }
   0x4 LB: > { %s522_s24 = sadd.s32 4294967295, %s683_s23   ;;  %s523_s25 = sadd.s32 4294967294, %s683_s23   ;;  %s683_s23 = sphi %s726_s23, %s18_s23   ;;  %s679_s22 = sphi %s724_s22, %s837_s22   ;;  %s675_s21 = sphi %s722_s21, %s836_s21   ;;  %s671_s20 = sphi %s720_s20, %s835_s20   ;;  %s667_s19 = sphi %s718_s19, %s834_s19   ;;  %s663_s18 = sphi %s716_s18, %s833_s18  }
   0x5   : > { %s30_s26 = sadd.s32 1, %s679_s22  ;;  %s158_s27 = sadd.s32 1, %s671_s20 }
   0x6   : > { %p32_p0 = scmp.ge.s32.totalorder %s30_s26, 2  ;;  %p168_p1 = scmp.ne.s32.totalorder %s671_s20, %s667_s19 }
   0x7   : > { %p169_p2 = scmp.eq.s32.totalorder %s522_s24, 1  ;;  %p174_p3 = scmp.ne.s32.totalorder %s667_s19, %s663_s18 }
   0x8   : > { %s839_s26 = smov (%p32_p0, %s30_s26), 0  ;;  %p175_p5 = scmp.eq.s32.totalorder %s523_s25, 1 }
   0x9   : > { %p756_p4 = por %p169_p2, %p168_p1  ;;  %s153_s29 = ssub.s32 %s679_s22, %s839_s26 }
   0xa   : > { %p526_p6 = scmp.ge.s32.totalorder %s683_s23, 1  ;;  %p156_p7 = scmp.eq.s32.totalorder %s153_s29, 0 }
   0xb   : > { %p763_p8 = por %p175_p5, %p174_p3  ;;  %p228_p9 = scmp.lt.s32.totalorder %s683_s23, 3 }
   0xc   : > { %s769_s6 = scalar_select %p156_p7, %s671_s20, %s158_s27  }
   0xd   : > { %p229_p10 = pnand %p526_p6, %p228_p9 }
   0xe   : > { %p270_p11 = scmp.lt.s32.totalorder (!%p229_p10), %s675_s21, 1  ;;  %s266_s7 = sand.u32 (!%p229_p10), 1, %s667_s19  }
   0xf   : > { %232 = sbr.rel (%p229_p10) target bundleno = 174 (0xae), region = 40  ;;  %s527_s8 = sshll.u32 (!%p229_p10), %s266_s7, 4 }
  0x10   : > { %s268_s13 = scalar_lea.vmem (!%p229_p10), [#allocation2], %s527_s8  ;;  %s625_s27 = scalar_lea.hbm (!%p229_p10), %s830_s5, 32 }
  0x14   : > { %v399_v0 = vld [vmem:[%s829_s4] sm:$0xff]  ;;  %s271_s9 = scalar_select %p270_p11, %s675_s21, 1  ;;  %v685_v1 = vmov 0   ;;  %vm299_vm0 = vcmask 1045504   ;;  %vm295_vm1 = vcmask 48128   ;;  %vm354_vm2 = vcmask 1043456  }
  0x15   : > { %604 = vset.pattern.permute.xlu0 %v685_v1  ;;  %v292_v2 = vld [vmem:[%s828_s3] sm:$0xff]  ;;  %vm350_vm3 = vcmask 31744  }
  0x16   : > { %402 = vperm.xlu0 %604, %v399_v0   ;;  %s545_s10 = sshll.u32 %s271_s9, 3  ;;  %s546_s11 = sshll.u32 %s271_s9, 4  ;;  %v290_v6 = vld [vmem:[%s827_s2] sm:$0xff] }
  0x17   : > { %s277_s14 = scalar_lea.vmem %s825_s0, %s545_s10  ;;  %s287_s17 = scalar_lea.vmem %s826_s1, %s546_s11 }
  0x18   : > { %v291_v3 = vld [vmem:[%s277_s14] sm:$0xff]  ;;  %v294_v5 = vld [vmem:[%s287_s17 + $0x8] sm:$0x3f]  ;;  %s547_s9 = sshll.u32 %s675_s21, 4  ;;  %s425_s14 = sshll.u32 %s268_s13, 4  ;;  %s426_s14 = int_to_ptr.vmem [resolvable:$true] %s425_s14 }
  0x19   : > { %v293_v4 = vld [vmem:[%s287_s17] sm:$0x3f]  ;;  %347 = vst [vmem:[#allocation1] ss:$2 sm:$0xff] %v291_v3  ;;  %534 = vmatpush.msk.msra.mxu1 %vm299_vm0, %v294_v5  ;;  %s423_s12 = scalar_lea.hbm %s830_s5, %s547_s9  ;;  %s410_s21 = scalar_lea.sflag [#allocation3], %s266_s7 }
  0x1a   : > { %532 = vmatpush.msk.msra.mxu0 %vm299_vm0, %v293_v4  ;;  %535 = vmatmul.msk.f32.vlgmr.msra.gmra.mxu1 %vm295_vm1, %v292_v2  ;;  %s427_s15 = sshll.u32 %s423_s12, 4  ;;  %s428_s15 = int_to_ptr.hbm [resolvable:$true] %s427_s15 }
  0x1b   : > { %533 = vmatmul.msk.f32.vlgmr.msra.gmra.mxu0 %vm295_vm1, %v292_v2  ;;  %s619_s16 = sshra.s32 %s428_s15, 4  ;;  %s620_s16 = int_to_ptr.hbm [resolvable:$true] %s619_s16 }
  0x1c   : > { %s621_s17 = scalar_lea.hbm %s620_s16, 16  ;;  %p626_p1 = scmp.lt.s32.totalorder %s620_s16, %s830_s5 }
  0x1d   : > { %p622_p12 = scmp.ne.s32.totalorder %s620_s16, %s621_s17  ;;  %p627_p2 = scmp.lt.s32.totalorder %s625_s27, %s621_s17 }
  0x1f   : > { %p623_p13 = pnand %p622_p12, %p756_p4  ;;  %p628_p3 = por %p627_p2, %p626_p1 }
  0x20   : > { %v348_v7 = vld.sshfl [vmem:[#allocation1] sm:$0xff pattern:$0x75316420]  ;;  %v349_v8 = vld.sshfl [vmem:[#allocation1 + $0x8] sm:$0xff pattern:$0x75316420] }
  0x21   : > { %536 = vmatpush.msk.msra.mxu2 %vm354_vm2, %v348_v7  ;;  %538 = vmatpush.msk.msra.mxu3 %vm354_vm2, %v349_v8  ;;  %p624_p0 = pneg %p623_p13 }
  0x22   : > { %537 = vmatmul.msk.f32.vlgmr.msra.gmra.mxu2 %vm350_vm3, %v290_v6  ;;  %539 = vmatmul.msk.f32.vlgmr.msra.gmra.mxu3 %vm350_vm3, %v290_v6 }
  0x23   : > { %p629_p5 = pnand %p628_p3, %p624_p0 }
  0x88   : > { %v403_v11 = vpop.permute.xlu0 %402 }
  0x97   : > { %v343_v10 = vpop.f32.mrf.mxu1 }
  0x98   : > { %v323_v9 = vpop.f32.mrf.mxu0 }
  0xa5   : > { %v376_v12 = vpop.f32.mrf.mxu2  ;;  %v396_v13 = vpop.f32.mrf.mxu3 }
  0xa6   : > { %v377_v14 = vadd.f32 %v376_v12, %v323_v9  ;;  %v397_v15 = vadd.f32 %v396_v13, %v343_v10 }
  0xa8   : > { %v405_v16 = vadd.f32 %v403_v11, %v377_v14  ;;  %v406_v17 = vadd.f32 %v403_v11, %v397_v15 }
  0xaa   : > { %407 = vst [vmem:[%s268_s13] sm:$0xff] %v405_v16 }
  0xab   : > { %408 = vst [vmem:[%s268_s13 + $0x8] sm:$0xff] %v406_v17 }
  0xac   : > { %632 = shalt.err (!%p629_p5)
}
  0xad   : > { %548 = dma.vmem_to_hbm [thread:$0]  (%p756_p4), %s426_s14, 256, %s428_s15, %s410_s21  }
  0xae PF: > { %p554_p6 = scmp.ge.s32.totalorder %s683_s23, 2  ;;  %s439_s7 = sand.u32 1, %s663_s18  }
  0xaf   : > { %s440_s9 = scalar_lea.sflag [#allocation3], %s439_s7 }
  0xb0   : > { %p551_p7 = pnand %p554_p6, %p763_p8 }
  0xb2   : > { %p552_p9 = pneg %p551_p7 }
  0xb4   : > { %658 = dma.done.wait (%p552_p9), %s440_s9, 256  }
  0xb5   : > { %660 = vsyncadd (%p552_p9), %s440_s9, 4294967040  ;;  %s18_s23 = sadd.s32 1, %s683_s23   ;;  %s833_s18 = smov %s667_s19 }
  0xb6   : > { %p15_p10 = scmp.ge.s32.totalorder %s18_s23, 4   ;;  %s834_s19 = smov %s671_s20 }
  0xb7   : > { %s835_s20 = smov %s769_s6  ;;  %s836_s21 = smov %s679_s22 }
  0xb8   : > { %s837_s22 = smov %s839_s26  ;;  %17 = sbr.rel (!%p15_p10) target bundleno = 4 (0x4), region = 78 }
  0xbd   :  { %446 = vsyncpa [#allocation3], 1 }
  0xbe   :  { %448 = vsyncpa [#allocation3 + $0x1], 1 }

</bundles_post_ra>
